<compile_context>
chip_gen: v7x
topology: tpu7x:2x2x1
jax: 0.10.0
libtpu: 0.0.40
codegen_flags: <defaults>
</compile_context>

<pallas_src>
import jax
import jax.numpy as jnp
from jax import lax
from jax.experimental import pallas as pl
from jax.experimental.pallas import tpu as pltpu

# Shapes implied by classifier.__init__ / forward.
IMG_CHANNELS = 1
H = W = 28
KH = KW = 3
NTAPS = KH * KW            # 9
OC = 16
OH = OW = H - KH + 1       # 26
SPATIAL = OH * OW          # 676
N_CLASSES = 10
FLAT = OC * SPATIAL        # 10816
N_BATCH = 2


def fused_classifier_kernel(p_ref, cw_ref, cb_ref, fcw_ref, sel_ref, fold_ref,
                            fcb_ref, o_ref):
    """Fused conv + ReLU + flatten + FC + log_softmax (all MXU work, 3 matmuls).

    p_ref:    (NTAPS*N, SPATIAL)   im2col patches, row = tap*N + n        (VMEM)
    cw_ref:   (OC*N, NTAPS*N)      kron(conv_w, I_N)                      (VMEM)
    cb_ref:   (OC*N, 1)            conv bias replicated per sample        (VMEM)
    fcw_ref:  (SPATIAL, OC*CLS)    FC weight, col = oc*CLS + c            (VMEM)
    sel_ref:  (N, OC*N, OC*CLS)    0/1 diagonal-selection masks           (VMEM)
    fold_ref: (OC*CLS, CLS)        vertically tiled identity              (VMEM)
    fcb_ref:  (1, CLS)             FC bias                                (VMEM)
    o_ref:    (N, CLS)             log_softmax output                     (VMEM)
    """
    n_batch = o_ref.shape[0]

    # Conv for all channels x samples in ONE MXU matmul:
    #   act[oc*N + n, s] = sum_k conv_w[oc, k] * patch[k*N + n, s]
    act = jnp.dot(cw_ref[...], p_ref[...], preferred_element_type=jnp.float32)
    act = jnp.maximum(act + cb_ref[...], 0.0)            # bias + fused ReLU (dense slab)

    # FC as ONE big contraction (K = SPATIAL):
    #   r[oc*N + n, oc'*CLS + c] = sum_s act[oc*N + n, s] * fc_w[c, oc'*SPATIAL + s]
    r = jnp.dot(act, fcw_ref[...], preferred_element_type=jnp.float32)   # (OC*N, OC*CLS)

    # Keep only oc == oc' entries per sample (cheap 0/1 mask, 8 vregs), reduce over
    # the row axis, then fold the 16 channel blocks with a tiny matmul:
    #   logits[n, c] = sum_oc r[oc*N + n, oc*CLS + c]
    rows = [jnp.sum(r * sel_ref[n], axis=0, keepdims=True) for n in range(n_batch)]
    s = jnp.concatenate(rows, axis=0)                                    # (N, OC*CLS)
    logits = jnp.dot(s, fold_ref[...], preferred_element_type=jnp.float32)
    logits = logits + fcb_ref[...]

    # numerically stable log_softmax over classes (dim=-1)
    m = jnp.max(logits, axis=-1, keepdims=True)
    sh = logits - m
    lse = jnp.log(jnp.sum(jnp.exp(sh), axis=-1, keepdims=True))
    o_ref[...] = sh - lse


def prepare_params(conv_w, conv_b, fc_w, fc_b, n_batch=N_BATCH):
    """One-time weight re-layout (run OUTSIDE the jitted forward)."""
    eye_n = jnp.eye(n_batch, dtype=jnp.float32)
    cw_big = jnp.kron(conv_w.reshape(OC, NTAPS).astype(jnp.float32), eye_n)  # (OC*N, 9*N)
    cb_big = jnp.repeat(conv_b.astype(jnp.float32), n_batch).reshape(OC * n_batch, 1)
    # fc_w: (CLS, OC*SPATIAL) -> (SPATIAL, OC*CLS) with column index oc*CLS + c
    fcw_p = (fc_w.astype(jnp.float32)
             .reshape(N_CLASSES, OC, SPATIAL)
             .transpose(2, 1, 0)
             .reshape(SPATIAL, OC * N_CLASSES))
    # sel[n, row, oc*CLS + c] = 1  iff  row == oc*N + n
    r_idx = jnp.arange(OC * n_batch)[:, None]                       # (OC*N, 1)
    col_oc = jnp.arange(OC * N_CLASSES)[None, :] // N_CLASSES       # (1, OC*CLS)
    sel = jnp.stack([(r_idx == col_oc * n_batch + n).astype(jnp.float32)
                     for n in range(n_batch)], axis=0)              # (N, OC*N, OC*CLS)
    fold = jnp.tile(jnp.eye(N_CLASSES, dtype=jnp.float32), (OC, 1))  # (OC*CLS, CLS)
    fcb = fc_b.astype(jnp.float32).reshape(1, N_CLASSES)
    return cw_big, cb_big, fcw_p, sel, fold, fcb


def classifier_forward(image, cw_big, cb_big, fcw_p, sel, fold, fcb):
    """image: (N, 1, 28, 28) f32 NCHW (PyTorch convention)."""
    n_batch = image.shape[0]
    x = image[:, 0, :, :]                                           # (N, 28, 28)
    # im2col layout plumbing: 9 shifted views, row = tap*N + n, 676-wide lane-dense.
    patches = jnp.stack(
        [x[:, kh:kh + OH, kw:kw + OW].reshape(n_batch, SPATIAL)
         for kh in range(KH) for kw in range(KW)],
        axis=0).reshape(NTAPS * n_batch, SPATIAL)                   # (9*N, 676)

    return pl.pallas_call(
        fused_classifier_kernel,
        out_shape=jax.ShapeDtypeStruct((n_batch, N_CLASSES), jnp.float32),
        in_specs=[pl.BlockSpec(memory_space=pltpu.VMEM)] * 7,
        out_specs=pl.BlockSpec(memory_space=pltpu.VMEM),
    )(patches, cw_big, cb_big, fcw_p, sel, fold, fcb)


if __name__ == "__main__":
    key = jax.random.PRNGKey(0)
    k1, k2, k3, k4, k5 = jax.random.split(key, 5)

    # deterministic synthetic parameters (shapes from classifier.__init__)
    image = jax.random.normal(k1, (N_BATCH, IMG_CHANNELS, H, W), dtype=jnp.float32)
    conv_w = jax.random.normal(k2, (OC, IMG_CHANNELS, KH, KW), dtype=jnp.float32) * 0.1
    conv_b = jax.random.normal(k3, (OC,), dtype=jnp.float32) * 0.1
    fc_w = jax.random.normal(k4, (N_CLASSES, FLAT), dtype=jnp.float32) * 0.01
    fc_b = jax.random.normal(k5, (N_CLASSES,), dtype=jnp.float32) * 0.1

    # one-time weight re-layout, outside the jitted forward
    prepped = prepare_params(conv_w, conv_b, fc_w, fc_b, n_batch=N_BATCH)
    prepped = jax.block_until_ready(prepped)

    fwd = jax.jit(classifier_forward)
    out = jax.block_until_ready(fwd(image, *prepped))
    assert out.shape == (N_BATCH, N_CLASSES)

    # pure-JAX reference (same math as the PyTorch forward) for self-check
    conv = lax.conv_general_dilated(
        image, conv_w, window_strides=(1, 1), padding="VALID",
        dimension_numbers=("NCHW", "OIHW", "NCHW"))
    conv = jnp.maximum(conv + conv_b[None, :, None, None], 0.0)
    ref_logits = conv.reshape(N_BATCH, FLAT) @ fc_w.T + fc_b
    ref = jax.nn.log_softmax(ref_logits, axis=-1)
    assert jnp.allclose(out, ref, rtol=1e-2, atol=1e-2), \
        float(jnp.max(jnp.abs(out - ref)))

    print("KERNEL_OK")
</pallas_src>

<mosaic_0001>
module attributes {stable_mosaic.version = 11 : i64} {
  func.func @fused_classifier_kernel(%arg0: memref<18x676xf32, #tpu.memory_space<vmem>>, %arg1: memref<32x18xf32, #tpu.memory_space<vmem>>, %arg2: memref<32x1xf32, #tpu.memory_space<vmem>>, %arg3: memref<676x160xf32, #tpu.memory_space<vmem>>, %arg4: memref<2x32x160xf32, #tpu.memory_space<vmem>>, %arg5: memref<160x10xf32, #tpu.memory_space<vmem>>, %arg6: memref<1x10xf32, #tpu.memory_space<vmem>>, %arg7: memref<2x10xf32, #tpu.memory_space<vmem>>) attributes {dimension_semantics = [], scalar_prefetch = 0 : i64, scratch_operands = 0 : i64, tpu.core_type = #tpu.core_type<tc>} {
    %c0 = arith.constant 0 : index
    %c0_0 = arith.constant 0 : index
    %0 = vector.load %arg1[%c0, %c0_0] : memref<32x18xf32, #tpu.memory_space<vmem>>, vector<32x18xf32>
    %c0_1 = arith.constant 0 : index
    %c0_2 = arith.constant 0 : index
    %1 = vector.load %arg0[%c0_1, %c0_2] : memref<18x676xf32, #tpu.memory_space<vmem>>, vector<18x676xf32>
    %cst = arith.constant dense<0.000000e+00> : vector<32x676xf32>
    %2 = tpu.matmul %0, %1, %cst {dimension_numbers = #tpu.dot_dimension_numbers<[1], [0], [0], [1], [0, 0, 1, 1], [], []>} : vector<32x18xf32>, vector<18x676xf32>, vector<32x676xf32> -> vector<32x676xf32>
    %c0_3 = arith.constant 0 : index
    %c0_4 = arith.constant 0 : index
    %3 = vector.load %arg2[%c0_3, %c0_4] : memref<32x1xf32, #tpu.memory_space<vmem>>, vector<32x1xf32>
    %4 = vector.broadcast %3 : vector<32x1xf32> to vector<32x676xf32>
    %5 = arith.addf %2, %4 : vector<32x676xf32>
    %cst_5 = arith.constant 0.000000e+00 : f32
    %6 = vector.broadcast %cst_5 : f32 to vector<32x676xf32>
    %7 = arith.maximumf %5, %6 : vector<32x676xf32>
    %c0_6 = arith.constant 0 : index
    %c0_7 = arith.constant 0 : index
    %8 = vector.load %arg3[%c0_6, %c0_7] : memref<676x160xf32, #tpu.memory_space<vmem>>, vector<676x160xf32>
    %cst_8 = arith.constant dense<0.000000e+00> : vector<32x160xf32>
    %9 = tpu.matmul %7, %8, %cst_8 {dimension_numbers = #tpu.dot_dimension_numbers<[1], [0], [0], [1], [0, 0, 1, 1], [], []>} : vector<32x676xf32>, vector<676x160xf32>, vector<32x160xf32> -> vector<32x160xf32>
    %c0_9 = arith.constant 0 : index
    %c0_10 = arith.constant 0 : index
    %c0_11 = arith.constant 0 : index
    %10 = vector.load %arg4[%c0_9, %c0_10, %c0_11] : memref<2x32x160xf32, #tpu.memory_space<vmem>>, vector<1x32x160xf32>
    %11 = vector.shape_cast %10 : vector<1x32x160xf32> to vector<32x160xf32>
    %12 = arith.mulf %9, %11 : vector<32x160xf32>
    %cst_12 = arith.constant dense<0.000000e+00> : vector<160xf32>
    %13 = vector.multi_reduction <add>, %12, %cst_12 [0] : vector<32x160xf32> to vector<160xf32>
    %14 = vector.shape_cast %13 : vector<160xf32> to vector<1x160xf32>
    %c1 = arith.constant 1 : index
    %c0_13 = arith.constant 0 : index
    %c0_14 = arith.constant 0 : index
    %15 = vector.load %arg4[%c1, %c0_13, %c0_14] : memref<2x32x160xf32, #tpu.memory_space<vmem>>, vector<1x32x160xf32>
    %16 = vector.shape_cast %15 : vector<1x32x160xf32> to vector<32x160xf32>
    %17 = arith.mulf %9, %16 : vector<32x160xf32>
    %cst_15 = arith.constant dense<0.000000e+00> : vector<160xf32>
    %18 = vector.multi_reduction <add>, %17, %cst_15 [0] : vector<32x160xf32> to vector<160xf32>
    %19 = vector.shape_cast %18 : vector<160xf32> to vector<1x160xf32>
    %20 = tpu.concatenate %14, %19 in 0 : vector<1x160xf32>, vector<1x160xf32> -> vector<2x160xf32>
    %c0_16 = arith.constant 0 : index
    %c0_17 = arith.constant 0 : index
    %21 = vector.load %arg5[%c0_16, %c0_17] : memref<160x10xf32, #tpu.memory_space<vmem>>, vector<160x10xf32>
    %cst_18 = arith.constant dense<0.000000e+00> : vector<2x10xf32>
    %22 = tpu.matmul %20, %21, %cst_18 {dimension_numbers = #tpu.dot_dimension_numbers<[1], [0], [0], [1], [0, 0, 1, 1], [], []>} : vector<2x160xf32>, vector<160x10xf32>, vector<2x10xf32> -> vector<2x10xf32>
    %c0_19 = arith.constant 0 : index
    %c0_20 = arith.constant 0 : index
    %23 = vector.load %arg6[%c0_19, %c0_20] : memref<1x10xf32, #tpu.memory_space<vmem>>, vector<1x10xf32>
    %24 = vector.broadcast %23 : vector<1x10xf32> to vector<2x10xf32>
    %25 = arith.addf %22, %24 : vector<2x10xf32>
    %cst_21 = arith.constant dense<0xFF800000> : vector<2xf32>
    %26 = vector.multi_reduction <maximumf>, %25, %cst_21 [1] : vector<2x10xf32> to vector<2xf32>
    %27 = vector.shape_cast %26 : vector<2xf32> to vector<2x1xf32>
    %28 = vector.broadcast %27 : vector<2x1xf32> to vector<2x10xf32>
    %29 = arith.subf %25, %28 : vector<2x10xf32>
    %30 = math.exp %29 : vector<2x10xf32>
    %cst_22 = arith.constant dense<0.000000e+00> : vector<2xf32>
    %31 = vector.multi_reduction <add>, %30, %cst_22 [1] : vector<2x10xf32> to vector<2xf32>
    %32 = vector.shape_cast %31 : vector<2xf32> to vector<2x1xf32>
    %33 = math.log %32 : vector<2x1xf32>
    %34 = vector.broadcast %33 : vector<2x1xf32> to vector<2x10xf32>
    %35 = arith.subf %29, %34 : vector<2x10xf32>
    %c0_23 = arith.constant 0 : index
    %c0_24 = arith.constant 0 : index
    %36 = vector.load %arg7[%c0_23, %c0_24] : memref<2x10xf32, #tpu.memory_space<vmem>>, vector<2x10xf32>
    tpu.vector_store %arg7[%c0_23, %c0_24], %35 {strides = array<i32>} : memref<2x10xf32, #tpu.memory_space<vmem>>, vector<2x10xf32>,
    return
  }
}

</mosaic_0001>

<bundles_post_ra>
// kernel: classifier_forward.1
= control target key start
LH: loop header
LB: loop body
LE: loop exit
PB: predicated region body
PF: predicated region fallthrough
CT: control target
= control target key end

     0   :  { %v1356_v7 = vmov 0.0   ;;  %vm86_vm0 = vcmask 1041408   ;;  %v1357_v13 = vmov 0   ;;  %vm73_vm1 = vcmask 146432   ;;  %s2212_s0 = inlined_call_operand.vmem [shape: f32[18,676], index: 0, kind: input, shape index: {}]   ;;  %s2213_s1 = inlined_call_operand.vmem [shape: f32[32,18], index: 1, kind: input, shape index: {}]   ;;  %s2214_s2 = inlined_call_operand.vmem [shape: f32[32,1], index: 2, kind: input, shape index: {}]   ;;  %s2215_s3 = inlined_call_operand.vmem [shape: f32[676,160], index: 3, kind: input, shape index: {}]   ;;  %s2216_s4 = inlined_call_operand.vmem [shape: f32[2,32,160], index: 4, kind: input, shape index: {}]   ;;  %s2217_s5 = inlined_call_operand.vmem [shape: f32[160,10], index: 5, kind: input, shape index: {}]   ;;  %s2218_s6 = inlined_call_operand.vmem [shape: f32[1,10], index: 6, kind: input, shape index: {}]   ;;  %s2219_s7 = inlined_call_operand.hbm [shape: f32[2,10], index: 7, kind: output, shape index: {}]  }
   0x1   :  { %v32_v0 = vld [vmem:[%s2212_s0 + $0x8] sm:$0xff]  ;;  %v38_v1 = vld [vmem:[%s2212_s0 + $0x38] sm:$0xff]  ;;  %v31_v5 = vld [vmem:[%s2212_s0] sm:$0xff]  ;;  %169 = vmatprep.mubr.f32.mxu0 %v1356_v7  ;;  %258 = vmatprep.mubr.f32.mxu1 %v1356_v7 }
   0x2   :  { %v34_v2 = vld [vmem:[%s2212_s0 + $0x18] sm:$0xff]  ;;  %v1096_v3 = vpack.c.bf16 %v38_v1, %v32_v0  ;;  %v40_v4 = vld [vmem:[%s2212_s0 + $0x48] sm:$0xff]  ;;  %v37_v6 = vld [vmem:[%s2212_s0 + $0x30] sm:$0xff]  ;;  %1326 = vset.pattern.permute.xlu0 %v1357_v13  ;;  %1327 = vset.pattern.permute.xlu1 %v1357_v13 }
   0x3   :  { %v1100_v8 = vpack.c.bf16 %v40_v4, %v34_v2  ;;  %v1098_v9 = vpack.c.bf16 %v37_v6, %v31_v5  ;;  %v33_v10 = vld [vmem:[%s2212_s0 + $0x10] sm:$0xff]  ;;  %v39_v11 = vld [vmem:[%s2212_s0 + $0x40] sm:$0xff]  ;;  %v44_v12 = vld [vmem:[%s2212_s0 + $0x68] sm:$0x3] }
   0x4   :  { %1097 = vmatprep.subr.bf16.mxu0 %v1096_v3  ;;  %v1102_v14 = vpack.c.bf16 %v39_v11, %v33_v10  ;;  %v46_v15 = vld [vmem:[%s2212_s0 + $0x78] sm:$0x3]  ;;  %v43_v16 = vld [vmem:[%s2212_s0 + $0x60] sm:$0x3]  ;;  %v36_v17 = vld [vmem:[%s2212_s0 + $0x28] sm:$0xff] }
   0x5   :  { %1101 = vmatprep.subr.bf16.mxu1 %v1100_v8  ;;  %1099 = vmatpush1.bf16.msra.mxu0 %v1098_v9  ;;  %v42_v18 = vld [vmem:[%s2212_s0 + $0x58] sm:$0xff]  ;;  %v35_v19 = vld [vmem:[%s2212_s0 + $0x20] sm:$0xff]  ;;  %v45_v20 = vld [vmem:[%s2212_s0 + $0x70] sm:$0x3] }
   0x6   :  { %1103 = vmatpush1.bf16.msra.mxu1 %v1102_v14  ;;  %1062 = vmatprep.subr.msk.mxu0 %vm86_vm0, %v44_v12  ;;  %v1452_v21 = vld [vmem:[%s2213_s1] sm:$0xff]  ;;  %v41_v22 = vld [vmem:[%s2212_s0 + $0x50] sm:$0xff]  ;;  %v1104_v23 = vpack.c.bf16 %v42_v18, %v36_v17  ;;  %v1464_v25 = vld [vmem:[%s2213_s1 + $0x8] sm:$0xff] }
   0x7   :  { %1068 = vmatprep.subr.msk.mxu1 %vm86_vm0, %v46_v15  ;;  %v49_v24 = vld [vmem:[%s2214_s2] sm:$0xff]  ;;  %v1106_v26 = vpack.c.bf16 %v41_v22, %v35_v19  ;;  %v50_v27 = vld [vmem:[%s2214_s2 + $0x8] sm:$0xff]  ;;  %v463_v29 = vld [vmem:[%s2215_s3 + $0x218] sm:$0xff] }
   0x8   :  { %55 = vperm.xlu0 %1326, %v49_v24   ;;  %v461_v28 = vld [vmem:[%s2215_s3 + $0x208] sm:$0xff]  ;;  %v399_v32 = vld [vmem:[%s2215_s3 + $0x18] sm:$0xff]  ;;  %v51_v33 = vld [vmem:[%s2214_s2 + $0x10] sm:$0xff] }
   0x9   :  { %1063 = vmatpush1.msk.msra.mxu0 %vm86_vm0, %v43_v16  ;;  %v48_v30 = vld [vmem:[%s2212_s0 + $0x88] sm:$0x3]  ;;  %v1172_v34 = vpack.c.bf16 %v463_v29, %v461_v28  ;;  %v47_v35 = vld [vmem:[%s2212_s0 + $0x80] sm:$0x3]  ;;  %v462_v38 = vld [vmem:[%s2215_s3 + $0x210] sm:$0xff]  ;;  %65 = vperm.xlu1 %1327, %v51_v33  }
   0xa   :  { %1069 = vmatpush1.msk.msra.mxu1 %vm86_vm0, %v45_v20  ;;  %1064 = vmatmul.mubr.msk.f32.vlgmr.msra.gmra.mrb[0].mxu0 %vm73_vm1, %v1452_v21  ;;  %v397_v31 = vld [vmem:[%s2215_s3 + $0x8] sm:$0xff]  ;;  %v460_v37 = vld [vmem:[%s2215_s3 + $0x200] sm:$0xff]  ;;  %v1512_v39 = vld [vmem:[%s2213_s1 + $0x10] sm:$0xff] }
   0xb   :  { %1070 = vmatmul.mubr.msk.f32.vlgmr.msra.gmra.mrb[0].mxu1 %vm73_vm1, %v1452_v21  ;;  %175 = vmatprep.mubr.f32.mxu0 %v1356_v7  ;;  %v1108_v36 = vpack.c.bf16 %v399_v32, %v397_v31  ;;  %v465_v40 = vld [vmem:[%s2215_s3 + $0x228] sm:$0xff]  ;;  %v467_v41 = vld [vmem:[%s2215_s3 + $0x238] sm:$0xff]  ;;  %v1174_v43 = vpack.c.bf16 %v462_v38, %v460_v37  ;;  %v464_v45 = vld [vmem:[%s2215_s3 + $0x220] sm:$0xff] }
   0xc   :  { %264 = vmatprep.mubr.f32.mxu1 %v1356_v7  ;;  %1105 = vmatprep.subr.bf16.mxu0 %v1104_v23  ;;  %v52_v42 = vld [vmem:[%s2214_s2 + $0x18] sm:$0xff]  ;;  %v1176_v44 = vpack.c.bf16 %v467_v41, %v465_v40  ;;  %v466_v46 = vld [vmem:[%s2215_s3 + $0x230] sm:$0xff]  ;;  %v469_v48 = vld [vmem:[%s2215_s3 + $0x248] sm:$0xff] }
   0xd   :  { %1107 = vmatpush1.bf16.msra.mxu0 %v1106_v26  ;;  %60 = vperm.xlu0 %1326, %v50_v27   ;;  %v1539_v47 = vld [vmem:[%s2213_s1 + $0x18] sm:$0xff]  ;;  %v396_v50 = vld [vmem:[%s2215_s3] sm:$0xff]  ;;  %v398_v51 = vld [vmem:[%s2215_s3 + $0x10] sm:$0xff]  ;;  %v1178_v54 = vpack.c.bf16 %v466_v46, %v464_v45 }
   0xe   :  { %1065 = vmatmul.mubr.msk.f32.gmra.mrb[2].mxu0 %vm73_vm1, %v1464_v25  ;;  %1074 = vmatprep.subr.msk.mxu0 %vm86_vm0, %v48_v30  ;;  %v471_v49 = vld [vmem:[%s2215_s3 + $0x258] sm:$0xff]  ;;  %v401_v52 = vld [vmem:[%s2215_s3 + $0x28] sm:$0xff]  ;;  %v468_v56 = vld [vmem:[%s2215_s3 + $0x240] sm:$0xff]  ;;  %v1110_v58 = vpack.c.bf16 %v398_v51, %v396_v50 }
   0xf   :  { %1071 = vmatmul.mubr.msk.f32.gmra.mrb[2].mxu1 %vm73_vm1, %v1464_v25  ;;  %181 = vmatprep.mubr.f32.mxu0 %v1356_v7  ;;  %v403_v53 = vld [vmem:[%s2215_s3 + $0x38] sm:$0xff]  ;;  %v1180_v55 = vpack.c.bf16 %v471_v49, %v469_v48  ;;  %v470_v57 = vld [vmem:[%s2215_s3 + $0x250] sm:$0xff]  ;;  %v473_v59 = vld [vmem:[%s2215_s3 + $0x268] sm:$0xff] }
  0x10   :  { %270 = vmatprep.mubr.f32.mxu1 %v1356_v7  ;;  %1173 = vmatprep.subr.bf16.mxu1 %v1172_v34  ;;  %v475_v60 = vld [vmem:[%s2215_s3 + $0x278] sm:$0xff]  ;;  %v1112_v61 = vpack.c.bf16 %v403_v53, %v401_v52  ;;  %v400_v62 = vld [vmem:[%s2215_s3 + $0x20] sm:$0xff]  ;;  %v402_v63 = vld [vmem:[%s2215_s3 + $0x30] sm:$0xff]  ;;  %v1182_v2 = vpack.c.bf16 %v470_v57, %v468_v56 }
  0x11   :  { %1075 = vmatpush1.msk.msra.mxu0 %vm86_vm0, %v47_v35  ;;  %70 = vperm.xlu1 %1327, %v52_v42   ;;  %v405_v0 = vld [vmem:[%s2215_s3 + $0x48] sm:$0xff]  ;;  %v407_v1 = vld [vmem:[%s2215_s3 + $0x58] sm:$0xff]  ;;  %v1184_v3 = vpack.c.bf16 %v475_v60, %v473_v59  ;;  %v472_v4 = vld [vmem:[%s2215_s3 + $0x260] sm:$0xff]  ;;  %v1114_v6 = vpack.c.bf16 %v402_v63, %v400_v62 }
  0x12   :  { %1066 = vmatmul.mubr.msk.f32.gmra.mrb[4].mxu0 %vm73_vm1, %v1512_v39  ;;  %1109 = vmatprep.subr.bf16.mxu0 %v1108_v36  ;;  %v474_v5 = vld [vmem:[%s2215_s3 + $0x270] sm:$0xff]  ;;  %v477_v8 = vld [vmem:[%s2215_s3 + $0x288] sm:$0xff]  ;;  %v479_v9 = vld [vmem:[%s2215_s3 + $0x298] sm:$0xff]  ;;  %v1116_v10 = vpack.c.bf16 %v407_v1, %v405_v0 }
  0x13   :  { %1072 = vmatmul.mubr.msk.f32.gmra.mrb[4].mxu1 %vm73_vm1, %v1512_v39  ;;  %187 = vmatprep.mubr.f32.mxu0 %v1356_v7  ;;  %v404_v11 = vld [vmem:[%s2215_s3 + $0x40] sm:$0xff]  ;;  %v406_v12 = vld [vmem:[%s2215_s3 + $0x50] sm:$0xff]  ;;  %v409_v13 = vld [vmem:[%s2215_s3 + $0x68] sm:$0xff]  ;;  %v1186_v15 = vpack.c.bf16 %v474_v5, %v472_v4  ;;  %v1188_v16 = vpack.c.bf16 %v479_v9, %v477_v8 }
  0x14   :  { %276 = vmatprep.mubr.f32.mxu1 %v1356_v7  ;;  %1175 = vmatpush1.bf16.msra.mxu1 %v1174_v43  ;;  %v411_v14 = vld [vmem:[%s2215_s3 + $0x78] sm:$0xff]  ;;  %v476_v17 = vld [vmem:[%s2215_s3 + $0x280] sm:$0xff]  ;;  %v478_v18 = vld [vmem:[%s2215_s3 + $0x290] sm:$0xff]  ;;  %v1118_v19 = vpack.c.bf16 %v406_v12, %v404_v11 }
  0x15   :  { %1177 = vmatprep.subr.bf16.mxu1 %v1176_v44  ;;  %v481_v20 = vld [vmem:[%s2215_s3 + $0x2a8] sm:$0xff]  ;;  %v1120_v22 = vpack.c.bf16 %v411_v14, %v409_v13  ;;  %v408_v23 = vld [vmem:[%s2215_s3 + $0x60] sm:$0xff]  ;;  %v410_v24 = vld [vmem:[%s2215_s3 + $0x70] sm:$0xff]  ;;  %v1190_v27 = vpack.c.bf16 %v478_v18, %v476_v17 }
  0x16   :  { %1067 = vmatmul.mubr.msk.f32.gmra.mrb[6].mxu0 %vm73_vm1, %v1539_v47  ;;  %v415_v26 = vld [vmem:[%s2215_s3 + $0x98] sm:$0xff]  ;;  %v480_v29 = vld [vmem:[%s2215_s3 + $0x2a0] sm:$0xff]  ;;  %v482_v30 = vld [vmem:[%s2215_s3 + $0x2b0] sm:$0xff]  ;;  %v1122_v31 = vpack.c.bf16 %v410_v24, %v408_v23 }
  0x17   :  { %1073 = vmatmul.mubr.msk.f32.gmra.mrb[6].mxu1 %vm73_vm1, %v1539_v47  ;;  %347 = vmatprep.mubr.f32.mxu0 %v1356_v7  ;;  %v485_v32 = vld [vmem:[%s2215_s3 + $0x2c8] sm:$0xff]  ;;  %v487_v33 = vld [vmem:[%s2215_s3 + $0x2d8] sm:$0xff]  ;;  %v412_v35 = vld [vmem:[%s2215_s3 + $0x80] sm:$0xff]  ;;  %v1194_v38 = vpack.c.bf16 %v482_v30, %v480_v29 }
  0x18   :  { %1179 = vmatpush1.bf16.msra.mxu1 %v1178_v54  ;;  %v417_v36 = vld [vmem:[%s2215_s3 + $0xa8] sm:$0xff]  ;;  %v419_v37 = vld [vmem:[%s2215_s3 + $0xb8] sm:$0xff]  ;;  %v484_v40 = vld [vmem:[%s2215_s3 + $0x2c0] sm:$0xff] }
  0x19   :  { %1181 = vmatprep.subr.bf16.mxu1 %v1180_v55  ;;  %v486_v41 = vld [vmem:[%s2215_s3 + $0x2d0] sm:$0xff]  ;;  %v489_v43 = vld [vmem:[%s2215_s3 + $0x2e8] sm:$0xff]  ;;  %v491_v44 = vld [vmem:[%s2215_s3 + $0x2f8] sm:$0xff]  ;;  %v1128_v45 = vpack.c.bf16 %v419_v37, %v417_v36 }
  0x1a   :  { %1076 = vmatmul.mubr.msk.f32.vlgmr.msra.gmra.mrb[8].mxu0 %vm73_vm1, %v1452_v21  ;;  %v483_v21 = vld [vmem:[%s2215_s3 + $0x2b8] sm:$0xff]  ;;  %v416_v46 = vld [vmem:[%s2215_s3 + $0xa0] sm:$0xff]  ;;  %v421_v48 = vld [vmem:[%s2215_s3 + $0xc8] sm:$0xff]  ;;  %v1198_v50 = vpack.c.bf16 %v486_v41, %v484_v40  ;;  %v1200_v51 = vpack.c.bf16 %v491_v44, %v489_v43 }
  0x1b   :  { %353 = vmatprep.mubr.f32.mxu0 %v1356_v7  ;;  %1111 = vmatpush1.bf16.msra.mxu0 %v1110_v58  ;;  %v1192_v28 = vpack.c.bf16 %v483_v21, %v481_v20  ;;  %v423_v49 = vld [vmem:[%s2215_s3 + $0xd8] sm:$0xff]  ;;  %v488_v52 = vld [vmem:[%s2215_s3 + $0x2e0] sm:$0xff]  ;;  %v490_v53 = vld [vmem:[%s2215_s3 + $0x2f0] sm:$0xff] }
  0x1c   :  { %1113 = vmatprep.subr.bf16.mxu0 %v1112_v61  ;;  %1183 = vmatpush1.bf16.msra.mxu1 %v1182_v2  ;;  %v493_v55 = vld [vmem:[%s2215_s3 + $0x308] sm:$0xff]  ;;  %v495_v56 = vld [vmem:[%s2215_s3 + $0x318] sm:$0xff]  ;;  %v1132_v57 = vpack.c.bf16 %v423_v49, %v421_v48  ;;  %v420_v58 = vld [vmem:[%s2215_s3 + $0xc0] sm:$0xff]  ;;  %v1202_v62 = vpack.c.bf16 %v490_v53, %v488_v52 }
  0x1d   :  { %1185 = vmatprep.subr.bf16.mxu1 %v1184_v3  ;;  %v422_v59 = vld [vmem:[%s2215_s3 + $0xd0] sm:$0xff]  ;;  %v425_v60 = vld [vmem:[%s2215_s3 + $0xe8] sm:$0xff]  ;;  %v427_v61 = vld [vmem:[%s2215_s3 + $0xf8] sm:$0xff]  ;;  %v1204_v63 = vpack.c.bf16 %v495_v56, %v493_v55 }
  0x1e   :  { %1077 = vmatmul.mubr.msk.f32.gmra.mrb[10].mxu0 %vm73_vm1, %v1464_v25  ;;  %v413_v25 = vld [vmem:[%s2215_s3 + $0x88] sm:$0xff]  ;;  %v492_v0 = vld [vmem:[%s2215_s3 + $0x300] sm:$0xff]  ;;  %v494_v1 = vld [vmem:[%s2215_s3 + $0x310] sm:$0xff]  ;;  %v1134_v2 = vpack.c.bf16 %v422_v59, %v420_v58  ;;  %v1136_v5 = vpack.c.bf16 %v427_v61, %v425_v60 }
  0x1f   :  { %359 = vmatprep.mubr.f32.mxu0 %v1356_v7  ;;  %1115 = vmatpush1.bf16.msra.mxu0 %v1114_v6  ;;  %v1124_v34 = vpack.c.bf16 %v415_v26, %v413_v25  ;;  %v497_v3 = vld [vmem:[%s2215_s3 + $0x328] sm:$0xff]  ;;  %v499_v4 = vld [vmem:[%s2215_s3 + $0x338] sm:$0xff]  ;;  %v424_v6 = vld [vmem:[%s2215_s3 + $0xe0] sm:$0xff]  ;;  %v1206_v11 = vpack.c.bf16 %v494_v1, %v492_v0 }
  0x20   :  { %1117 = vmatprep.subr.bf16.mxu0 %v1116_v10  ;;  %1187 = vmatpush1.bf16.msra.mxu1 %v1186_v15  ;;  %v426_v8 = vld [vmem:[%s2215_s3 + $0xf0] sm:$0xff]  ;;  %v429_v9 = vld [vmem:[%s2215_s3 + $0x108] sm:$0xff]  ;;  %v431_v10 = vld [vmem:[%s2215_s3 + $0x118] sm:$0xff] }
  0x21   :  { %1189 = vmatprep.subr.bf16.mxu1 %v1188_v16 }
  0x22   :  { %1078 = vmatmul.mubr.msk.f32.gmra.mrb[12].mxu0 %vm73_vm1, %v1512_v39  ;;  %v1196_v39 = vpack.c.bf16 %v487_v33, %v485_v32 }
  0x23   :  { %365 = vmatprep.mubr.f32.mxu0 %v1356_v7  ;;  %1119 = vmatpush1.bf16.msra.mxu0 %v1118_v19  ;;  %v414_v7 = vld [vmem:[%s2215_s3 + $0x90] sm:$0xff] }
  0x24   :  { %1121 = vmatprep.subr.bf16.mxu0 %v1120_v22  ;;  %1191 = vmatpush1.bf16.msra.mxu1 %v1190_v27  ;;  %v1126_v42 = vpack.c.bf16 %v414_v7, %v412_v35 }
  0x25   :  { %1193 = vmatprep.subr.bf16.mxu1 %v1192_v28 }
  0x26   :  { %1079 = vmatmul.mubr.msk.f32.gmra.mrb[14].mxu0 %vm73_vm1, %v1539_v47  ;;  %v418_v47 = vld [vmem:[%s2215_s3 + $0xb0] sm:$0xff] }
  0x27   :  { %1123 = vmatpush1.bf16.msra.mxu0 %v1122_v31  ;;  %v1130_v54 = vpack.c.bf16 %v418_v47, %v416_v46 }
  0x28   :  { %1125 = vmatprep.subr.bf16.mxu0 %v1124_v34  ;;  %1195 = vmatpush1.bf16.msra.mxu1 %v1194_v38 }
  0x29   :  { %1197 = vmatprep.subr.bf16.mxu1 %v1196_v39 }
  0x2b   :  { %1127 = vmatpush1.bf16.msra.mxu0 %v1126_v42 }
  0x2c   :  { %1129 = vmatprep.subr.bf16.mxu0 %v1128_v45  ;;  %1199 = vmatpush1.bf16.msra.mxu1 %v1198_v50 }
  0x2d   :  { %1201 = vmatprep.subr.bf16.mxu1 %v1200_v51 }
  0x2f   :  { %1131 = vmatpush1.bf16.msra.mxu0 %v1130_v54 }
  0x30   :  { %1133 = vmatprep.subr.bf16.mxu0 %v1132_v57  ;;  %1203 = vmatpush1.bf16.msra.mxu1 %v1202_v62 }
  0x31   :  { %12 = vsyncpa [#allocation3], 0  ;;  %1205 = vmatprep.subr.bf16.mxu1 %v1204_v63  ;;  %v1208_v12 = vpack.c.bf16 %v499_v4, %v497_v3  ;;  %v496_v13 = vld [vmem:[%s2215_s3 + $0x320] sm:$0xff]  ;;  %v498_v14 = vld [vmem:[%s2215_s3 + $0x330] sm:$0xff]  ;;  %v1138_v15 = vpack.c.bf16 %v426_v8, %v424_v6  ;;  %v1140_v18 = vpack.c.bf16 %v431_v10, %v429_v9  ;;  %vm566_vm2 = vcmask 293888   ;;  %s1359_s2 = smov [#allocation2]  }
  0x32   :  { %v501_v16 = vld [vmem:[%s2215_s3 + $0x348] sm:$0xff]  ;;  %v503_v17 = vld [vmem:[%s2215_s3 + $0x358] sm:$0xff]  ;;  %v428_v19 = vld [vmem:[%s2215_s3 + $0x100] sm:$0xff]  ;;  %v1210_v23 = vpack.c.bf16 %v498_v14, %v496_v13  ;;  %vm579_vm3 = vcmask 1043456   ;;  %vm878_vm4 = vcmask 261120   ;;  %vm931_vm5 = vcmask 1040384  }
  0x33   :  { %1135 = vmatpush1.bf16.msra.mxu0 %v1134_v2  ;;  %v430_v20 = vld [vmem:[%s2215_s3 + $0x110] sm:$0xff]  ;;  %v433_v21 = vld [vmem:[%s2215_s3 + $0x128] sm:$0xff]  ;;  %v435_v22 = vld [vmem:[%s2215_s3 + $0x138] sm:$0xff]  ;;  %v1212_v24 = vpack.c.bf16 %v503_v17, %v501_v16  ;;  %vm1034_vm6 = vcmask 74752  }
  0x34   :  { %1137 = vmatprep.subr.bf16.mxu0 %v1136_v5  ;;  %1207 = vmatpush1.bf16.msra.mxu1 %v1206_v11  ;;  %v500_v25 = vld [vmem:[%s2215_s3 + $0x340] sm:$0xff]  ;;  %v502_v26 = vld [vmem:[%s2215_s3 + $0x350] sm:$0xff]  ;;  %v1142_v27 = vpack.c.bf16 %v430_v20, %v428_v19  ;;  %v505_v28 = vld [vmem:[%s2215_s3 + $0x368] sm:$0xff]  ;;  %v1144_v30 = vpack.c.bf16 %v435_v22, %v433_v21 }
  0x35   :  { %1209 = vmatprep.subr.bf16.mxu1 %v1208_v12  ;;  %v507_v29 = vld [vmem:[%s2215_s3 + $0x378] sm:$0xff]  ;;  %v432_v31 = vld [vmem:[%s2215_s3 + $0x120] sm:$0xff]  ;;  %v434_v32 = vld [vmem:[%s2215_s3 + $0x130] sm:$0xff]  ;;  %v1214_v35 = vpack.c.bf16 %v502_v26, %v500_v25 }
  0x36   :  { %v437_v33 = vld [vmem:[%s2215_s3 + $0x148] sm:$0xff]  ;;  %v439_v34 = vld [vmem:[%s2215_s3 + $0x158] sm:$0xff]  ;;  %v1216_v7 = vpack.c.bf16 %v507_v29, %v505_v28  ;;  %v504_v36 = vld [vmem:[%s2215_s3 + $0x360] sm:$0xff]  ;;  %v1146_v38 = vpack.c.bf16 %v434_v32, %v432_v31 }
  0x37   :  { %1139 = vmatpush1.bf16.msra.mxu0 %v1138_v15  ;;  %v506_v37 = vld [vmem:[%s2215_s3 + $0x370] sm:$0xff]  ;;  %v509_v39 = vld [vmem:[%s2215_s3 + $0x388] sm:$0xff]  ;;  %v511_v40 = vld [vmem:[%s2215_s3 + $0x398] sm:$0xff]  ;;  %v1148_v41 = vpack.c.bf16 %v439_v34, %v437_v33 }
  0x38   :  { %1141 = vmatprep.subr.bf16.mxu0 %v1140_v18  ;;  %1211 = vmatpush1.bf16.msra.mxu1 %v1210_v23  ;;  %v436_v42 = vld [vmem:[%s2215_s3 + $0x140] sm:$0xff]  ;;  %v438_v43 = vld [vmem:[%s2215_s3 + $0x150] sm:$0xff]  ;;  %v441_v44 = vld [vmem:[%s2215_s3 + $0x168] sm:$0xff]  ;;  %v1218_v46 = vpack.c.bf16 %v506_v37, %v504_v36  ;;  %v1220_v47 = vpack.c.bf16 %v511_v40, %v509_v39 }
  0x39   :  { %1213 = vmatprep.subr.bf16.mxu1 %v1212_v24  ;;  %v443_v45 = vld [vmem:[%s2215_s3 + $0x178] sm:$0xff]  ;;  %v508_v48 = vld [vmem:[%s2215_s3 + $0x380] sm:$0xff]  ;;  %v510_v49 = vld [vmem:[%s2215_s3 + $0x390] sm:$0xff]  ;;  %v1150_v50 = vpack.c.bf16 %v438_v43, %v436_v42 }
  0x3a   :  { %v513_v51 = vld [vmem:[%s2215_s3 + $0x3a8] sm:$0xff]  ;;  %v515_v52 = vld [vmem:[%s2215_s3 + $0x3b8] sm:$0xff]  ;;  %v1152_v53 = vpack.c.bf16 %v443_v45, %v441_v44  ;;  %v440_v54 = vld [vmem:[%s2215_s3 + $0x160] sm:$0xff]  ;;  %v1222_v58 = vpack.c.bf16 %v510_v49, %v508_v48 }
  0x3b   :  { %1143 = vmatpush1.bf16.msra.mxu0 %v1142_v27  ;;  %v442_v55 = vld [vmem:[%s2215_s3 + $0x170] sm:$0xff]  ;;  %v445_v56 = vld [vmem:[%s2215_s3 + $0x188] sm:$0xff]  ;;  %v447_v57 = vld [vmem:[%s2215_s3 + $0x198] sm:$0xff]  ;;  %v1224_v59 = vpack.c.bf16 %v515_v52, %v513_v51 }
  0x3c   :  { %1145 = vmatprep.subr.bf16.mxu0 %v1144_v30  ;;  %1215 = vmatpush1.bf16.msra.mxu1 %v1214_v35  ;;  %v512_v60 = vld [vmem:[%s2215_s3 + $0x3a0] sm:$0xff]  ;;  %v514_v61 = vld [vmem:[%s2215_s3 + $0x3b0] sm:$0xff]  ;;  %v1154_v62 = vpack.c.bf16 %v442_v55, %v440_v54  ;;  %v517_v63 = vld [vmem:[%s2215_s3 + $0x3c8] sm:$0xff]  ;;  %v1156_v1 = vpack.c.bf16 %v447_v57, %v445_v56 }
  0x3d   :  { %1217 = vmatprep.subr.bf16.mxu1 %v1216_v7  ;;  %v519_v0 = vld [vmem:[%s2215_s3 + $0x3d8] sm:$0xff]  ;;  %v444_v2 = vld [vmem:[%s2215_s3 + $0x180] sm:$0xff]  ;;  %v446_v3 = vld [vmem:[%s2215_s3 + $0x190] sm:$0xff]  ;;  %v1226_v6 = vpack.c.bf16 %v514_v61, %v512_v60 }
  0x3e   :  { %v449_v4 = vld [vmem:[%s2215_s3 + $0x1a8] sm:$0xff]  ;;  %v451_v5 = vld [vmem:[%s2215_s3 + $0x1b8] sm:$0xff]  ;;  %v1228_v8 = vpack.c.bf16 %v519_v0, %v517_v63  ;;  %v516_v9 = vld [vmem:[%s2215_s3 + $0x3c0] sm:$0xff]  ;;  %v1158_v11 = vpack.c.bf16 %v446_v3, %v444_v2 }
  0x3f   :  { %1147 = vmatpush1.bf16.msra.mxu0 %v1146_v38  ;;  %v518_v10 = vld [vmem:[%s2215_s3 + $0x3d0] sm:$0xff]  ;;  %v1160_v12 = vpack.c.bf16 %v451_v5, %v449_v4  ;;  %v448_v13 = vld [vmem:[%s2215_s3 + $0x1a0] sm:$0xff]  ;;  %v453_v15 = vld [vmem:[%s2215_s3 + $0x1c8] sm:$0xff] }
  0x40   :  { %1149 = vmatprep.subr.bf16.mxu0 %v1148_v41  ;;  %1219 = vmatpush1.bf16.msra.mxu1 %v1218_v46  ;;  %v450_v14 = vld [vmem:[%s2215_s3 + $0x1b0] sm:$0xff]  ;;  %v455_v16 = vld [vmem:[%s2215_s3 + $0x1d8] sm:$0xff]  ;;  %v1230_v17 = vpack.c.bf16 %v518_v10, %v516_v9  ;;  %v452_v20 = vld [vmem:[%s2215_s3 + $0x1c0] sm:$0xff] }
  0x41   :  { %1221 = vmatprep.subr.bf16.mxu1 %v1220_v47  ;;  %v1162_v18 = vpack.c.bf16 %v450_v14, %v448_v13  ;;  %v1164_v19 = vpack.c.bf16 %v455_v16, %v453_v15  ;;  %v454_v21 = vld [vmem:[%s2215_s3 + $0x1d0] sm:$0xff]  ;;  %v521_v23 = vld [vmem:[%s2215_s3 + $0x3e8] sm:$0xff]  ;;  %v523_v24 = vld [vmem:[%s2215_s3 + $0x3f8] sm:$0xff] }
  0x42   :  { %v1166_v22 = vpack.c.bf16 %v454_v21, %v452_v20  ;;  %v1232_v25 = vpack.c.bf16 %v523_v24, %v521_v23  ;;  %v457_v26 = vld [vmem:[%s2215_s3 + $0x1e8] sm:$0xff]  ;;  %v459_v27 = vld [vmem:[%s2215_s3 + $0x1f8] sm:$0xff]  ;;  %v520_v28 = vld [vmem:[%s2215_s3 + $0x3e0] sm:$0xff] }
  0x43   :  { %1151 = vmatpush1.bf16.msra.mxu0 %v1150_v50  ;;  %v1168_v29 = vpack.c.bf16 %v459_v27, %v457_v26  ;;  %v522_v30 = vld [vmem:[%s2215_s3 + $0x3f0] sm:$0xff]  ;;  %v456_v31 = vld [vmem:[%s2215_s3 + $0x1e0] sm:$0xff]  ;;  %v525_v35 = vld [vmem:[%s2215_s3 + $0x408] sm:$0xff] }
  0x44   :  { %1153 = vmatprep.subr.bf16.mxu0 %v1152_v53  ;;  %1223 = vmatpush1.bf16.msra.mxu1 %v1222_v58  ;;  %v458_v32 = vld [vmem:[%s2215_s3 + $0x1f0] sm:$0xff]  ;;  %v1234_v33 = vpack.c.bf16 %v522_v30, %v520_v28  ;;  %v527_v7 = vld [vmem:[%s2215_s3 + $0x418] sm:$0xff]  ;;  %v524_v45 = vld [vmem:[%s2215_s3 + $0x400] sm:$0xff] }
  0x45   :  { %1225 = vmatprep.subr.bf16.mxu1 %v1224_v59  ;;  %v1170_v34 = vpack.c.bf16 %v458_v32, %v456_v31  ;;  %v1236_v36 = vpack.c.bf16 %v527_v7, %v525_v35  ;;  %v526_v46 = vld [vmem:[%s2215_s3 + $0x410] sm:$0xff]  ;;  %v529_v50 = vld [vmem:[%s2215_s3 + $0x428] sm:$0xff]  ;;  %v531_v51 = vld [vmem:[%s2215_s3 + $0x438] sm:$0xff] }
  0x46   :  { %v1238_v59 = vpack.c.bf16 %v526_v46, %v524_v45  ;;  %v1240_v0 = vpack.c.bf16 %v531_v51, %v529_v50  ;;  %v530_v2 = vld [vmem:[%s2215_s3 + $0x430] sm:$0xff]  ;;  %v533_v4 = vld [vmem:[%s2215_s3 + $0x448] sm:$0xff]  ;;  %v535_v5 = vld [vmem:[%s2215_s3 + $0x458] sm:$0xff] }
  0x47   :  { %1155 = vmatpush1.bf16.msra.mxu0 %v1154_v62  ;;  %v534_v20 = vld [vmem:[%s2215_s3 + $0x450] sm:$0xff]  ;;  %v539_v26 = vld [vmem:[%s2215_s3 + $0x478] sm:$0xff] }
  0x48   :  { %1157 = vmatprep.subr.bf16.mxu0 %v1156_v1  ;;  %1227 = vmatpush1.bf16.msra.mxu1 %v1226_v6  ;;  %v528_v1 = vld [vmem:[%s2215_s3 + $0x420] sm:$0xff] }
  0x49   :  { %1229 = vmatprep.subr.bf16.mxu1 %v1228_v8 }
  0x4b   :  { %1159 = vmatpush1.bf16.msra.mxu0 %v1158_v11 }
  0x4c   :  { %1161 = vmatprep.subr.bf16.mxu0 %v1160_v12  ;;  %1231 = vmatpush1.bf16.msra.mxu1 %v1230_v17  ;;  %v1242_v12 = vpack.c.bf16 %v530_v2, %v528_v1  ;;  %v546_v1 = vld [vmem:[%s2215_s3 + $0x4b0] sm:$0xff]  ;;  %v549_v2 = vld [vmem:[%s2215_s3 + $0x4c8] sm:$0xff] }
  0x4d   :  { %1233 = vmatprep.subr.bf16.mxu1 %v1232_v25  ;;  %v537_v25 = vld [vmem:[%s2215_s3 + $0x468] sm:$0xff] }
  0x4f   :  { %1163 = vmatpush1.bf16.msra.mxu0 %v1162_v18  ;;  %v1244_v18 = vpack.c.bf16 %v535_v5, %v533_v4 }
  0x50   :  { %1165 = vmatprep.subr.bf16.mxu0 %v1164_v19  ;;  %1235 = vmatpush1.bf16.msra.mxu1 %v1234_v33  ;;  %v532_v19 = vld [vmem:[%s2215_s3 + $0x440] sm:$0xff] }
  0x51   :  { %1237 = vmatprep.subr.bf16.mxu1 %v1236_v36  ;;  %v1246_v33 = vpack.c.bf16 %v534_v20, %v532_v19  ;;  %v1248_v36 = vpack.c.bf16 %v539_v26, %v537_v25  ;;  %v557_v19 = vld [vmem:[%s2215_s3 + $0x508] sm:$0xff]  ;;  %v559_v20 = vld [vmem:[%s2215_s3 + $0x518] sm:$0xff]  ;;  %v558_v25 = vld [vmem:[%s2215_s3 + $0x510] sm:$0xff] }
  0x52   :  { %v561_v26 = vld [vmem:[%s2215_s3 + $0x528] sm:$0xff] }
  0x53   :  { %1167 = vmatpush1.bf16.msra.mxu0 %v1166_v22 }
  0x54   :  { %1169 = vmatprep.subr.bf16.mxu0 %v1168_v29 }
  0x57   :  { %1171 = vmatpush1.bf16.msra.mxu0 %v1170_v34 }
  0x87   :  { %v1918_v37 = vpop.permute.xlu0 %55 }
  0x88   :  { %v1938_v54 = vpop.permute.xlu1 %65 }
  0x8c   :  { %v1929_v48 = vpop.permute.xlu0 %60 }
  0x90   :  { %v1966_v24 = vpop.permute.xlu1 %70 }
  0xdd   :  { %v171_v38 = vpop.f32.mrb[0].mxu0 }
  0xde   :  { %v172_v39 = vadd.f32 %v171_v38, %v1918_v37  ;;  %v260_v40 = vpop.f32.mrb[0].mxu1  ;;  %v173_v41 = vpop.f32.mrb[1].mxu0  ;;  %v536_v38 = vld [vmem:[%s2215_s3 + $0x460] sm:$0xff] }
  0xdf   :  { %v261_v42 = vadd.f32 %v260_v40, %v1918_v37  ;;  %v174_v43 = vadd.f32 %v173_v41, %v1918_v37  ;;  %v262_v44 = vpop.f32.mrb[1].mxu1 }
  0xe0   :  { %v372_v47 = vmax.f32 %v172_v39, 0.0  ;;  %v263_v49 = vadd.f32 %v262_v44, %v1918_v37  ;;  %v538_v39 = vld [vmem:[%s2215_s3 + $0x470] sm:$0xff] }
  0xe1   :  { %v373_v52 = vmax.f32 %v174_v43, 0.0  ;;  %v177_v53 = vpop.f32.mrb[2].mxu0  ;;  %v374_v60 = vmax.f32 %v261_v42, 0.0  ;;  %v541_v42 = vld [vmem:[%s2215_s3 + $0x488] sm:$0xff]  ;;  %v543_v43 = vld [vmem:[%s2215_s3 + $0x498] sm:$0xff]  ;;  %v1250_v51 = vpack.c.bf16 %v538_v39, %v536_v38 }
  0xe2   :  { %v375_v55 = vmax.f32 %v263_v49, 0.0  ;;  %v178_v56 = vadd.f32 %v177_v53, %v1929_v48  ;;  %v266_v57 = vpop.f32.mrb[2].mxu1  ;;  %v179_v58 = vpop.f32.mrb[3].mxu0  ;;  %v1252_v53 = vpack.c.bf16 %v543_v43, %v541_v42 }
  0xe3   :  { %v267_v61 = vadd.f32 %v266_v57, %v1929_v48  ;;  %v180_v62 = vadd.f32 %v179_v58, %v1929_v48  ;;  %v268_v63 = vpop.f32.mrb[3].mxu1  ;;  %650 = vmatprep.mubr.f32.mxu0 %v373_v52  ;;  %v545_v57 = vld [vmem:[%s2215_s3 + $0x4a8] sm:$0xff]  ;;  %v547_v58 = vld [vmem:[%s2215_s3 + $0x4b8] sm:$0xff] }
  0xe4   :  { %v269_v3 = vadd.f32 %v268_v63, %v1929_v48  ;;  %739 = vmatprep.mubr.f32.mxu1 %v375_v55  ;;  %651 = vmatmul.mubr.f32.vlgmr.msra.gmra.mrb[16].mxu0 %v372_v47  ;;  %v378_v9 = vmax.f32 %v178_v56, 0.0  ;;  %v540_v55 = vld [vmem:[%s2215_s3 + $0x480] sm:$0xff]  ;;  %v542_v56 = vld [vmem:[%s2215_s3 + $0x490] sm:$0xff]  ;;  %v1256_v63 = vpack.c.bf16 %v547_v58, %v545_v57  ;;  %v941_v58 = vld [vmem:[%s2217_s5 + $0x38] sm:$0xff] }
  0xe5   :  { %v379_v6 = vmax.f32 %v180_v62, 0.0  ;;  %740 = vmatmul.mubr.f32.vlgmr.msra.gmra.mrb[8].mxu1 %v374_v60  ;;  %v183_v8 = vpop.f32.mrb[4].mxu0  ;;  %v380_v15 = vmax.f32 %v267_v61, 0.0  ;;  %v1254_v62 = vpack.c.bf16 %v542_v56, %v540_v55  ;;  %v939_v55 = vld [vmem:[%s2217_s5 + $0x28] sm:$0xff]  ;;  %v940_v57 = vld [vmem:[%s2217_s5 + $0x30] sm:$0xff] }
  0xe6   :  { %v381_v10 = vmax.f32 %v269_v3, 0.0  ;;  %1239 = vmatpush1.bf16.msra.mxu1 %v1238_v59  ;;  %v272_v11 = vpop.f32.mrb[4].mxu1  ;;  %v184_v13 = vadd.f32 %v183_v8, %v1938_v54  ;;  %v185_v14 = vpop.f32.mrb[5].mxu0  ;;  %v551_v3 = vld [vmem:[%s2215_s3 + $0x4d8] sm:$0xff] }
  0xe7   :  { %656 = vmatprep.mubr.f32.mxu0 %v379_v6  ;;  %1241 = vmatprep.subr.bf16.mxu1 %v1240_v0  ;;  %v274_v16 = vpop.f32.mrb[5].mxu1  ;;  %v186_v17 = vadd.f32 %v185_v14, %v1938_v54  ;;  %v273_v21 = vadd.f32 %v272_v11, %v1938_v54  ;;  %v544_v0 = vld [vmem:[%s2215_s3 + $0x4a0] sm:$0xff]  ;;  %v1260_v8 = vpack.c.bf16 %v551_v3, %v549_v2  ;;  %v553_v11 = vld [vmem:[%s2215_s3 + $0x4e8] sm:$0xff] }
  0xe8   :  { %745 = vmatprep.mubr.f32.mxu1 %v381_v10  ;;  %v275_v22 = vadd.f32 %v274_v16, %v1938_v54  ;;  %657 = vmatmul.mubr.f32.gmra.mrb[18].mxu0 %v378_v9  ;;  %v384_v23 = vmax.f32 %v184_v13, 0.0  ;;  %v1258_v5 = vpack.c.bf16 %v546_v1, %v544_v0  ;;  %v548_v9 = vld [vmem:[%s2215_s3 + $0x4c0] sm:$0xff]  ;;  %v550_v10 = vld [vmem:[%s2215_s3 + $0x4d0] sm:$0xff]  ;;  %v945_v0 = vld [vmem:[%s2217_s5 + $0x58] sm:$0xff] }
  0xe9   :  { %746 = vmatmul.mubr.f32.gmra.mrb[10].mxu1 %v380_v15  ;;  %v385_v27 = vmax.f32 %v186_v17, 0.0  ;;  %v189_v28 = vpop.f32.mrb[6].mxu0  ;;  %v386_v29 = vmax.f32 %v273_v21, 0.0  ;;  %v1262_v14 = vpack.c.bf16 %v550_v10, %v548_v9  ;;  %v552_v17 = vld [vmem:[%s2215_s3 + $0x4e0] sm:$0xff]  ;;  %v947_v3 = vld [vmem:[%s2217_s5 + $0x68] sm:$0xff] }
  0xea   :  { %v387_v30 = vmax.f32 %v275_v22, 0.0  ;;  %1243 = vmatpush1.bf16.msra.mxu1 %v1242_v12  ;;  %v278_v31 = vpop.f32.mrb[6].mxu1  ;;  %v191_v32 = vpop.f32.mrb[7].mxu0  ;;  %v190_v34 = vadd.f32 %v189_v28, %v1966_v24  ;;  %v555_v12 = vld [vmem:[%s2215_s3 + $0x4f8] sm:$0xff]  ;;  %v1268_v22 = vpack.c.bf16 %v559_v20, %v557_v19  ;;  %v946_v2 = vld [vmem:[%s2217_s5 + $0x60] sm:$0xff]  ;;  %v951_v10 = vld [vmem:[%s2217_s5 + $0x88] sm:$0xff] }
  0xeb   :  { %1245 = vmatprep.subr.bf16.mxu1 %v1244_v18  ;;  %v192_v35 = vadd.f32 %v191_v32, %v1966_v24  ;;  %v280_v7 = vpop.f32.mrb[7].mxu1  ;;  %v279_v40 = vadd.f32 %v278_v31, %v1966_v24  ;;  %662 = vmatprep.mubr.f32.mxu0 %v385_v27  ;;  %v1264_v16 = vpack.c.bf16 %v555_v12, %v553_v11  ;;  %v554_v18 = vld [vmem:[%s2215_s3 + $0x4f0] sm:$0xff]  ;;  %v563_v27 = vld [vmem:[%s2215_s3 + $0x538] sm:$0xff]  ;;  %v950_v9 = vld [vmem:[%s2217_s5 + $0x80] sm:$0xff] }
  0xec   :  { %v281_v41 = vadd.f32 %v280_v7, %v1966_v24  ;;  %751 = vmatprep.mubr.f32.mxu1 %v387_v30  ;;  %663 = vmatmul.mubr.f32.gmra.mrb[20].mxu0 %v384_v23  ;;  %v390_v44 = vmax.f32 %v190_v34, 0.0  ;;  %v1266_v21 = vpack.c.bf16 %v554_v18, %v552_v17  ;;  %v556_v23 = vld [vmem:[%s2215_s3 + $0x500] sm:$0xff]  ;;  %v562_v31 = vld [vmem:[%s2215_s3 + $0x530] sm:$0xff]  ;;  %v1301_v11 = vpack.c.bf16 %v951_v10, %v950_v9  ;;  %v860_v10 = vld [vmem:[%s2216_s4 + $0x38] sm:$0xff] }
  0xed   :  { %v391_v45 = vmax.f32 %v192_v35, 0.0  ;;  %v1990_v46 = vpop.f32.mrb[8].mxu0  ;;  %752 = vmatmul.mubr.f32.gmra.mrb[12].mxu1 %v386_v29  ;;  %v392_v47 = vmax.f32 %v279_v40, 0.0  ;;  %v1270_v28 = vpack.c.bf16 %v558_v25, %v556_v23  ;;  %v1272_v29 = vpack.c.bf16 %v563_v27, %v561_v26  ;;  %v560_v30 = vld [vmem:[%s2215_s3 + $0x520] sm:$0xff]  ;;  %v952_v12 = vld [vmem:[%s2217_s5 + $0x90] sm:$0xff] }
  0xee   :  { %v393_v49 = vmax.f32 %v281_v41, 0.0  ;;  %1247 = vmatpush1.bf16.msra.mxu1 %v1246_v33  ;;  %v351_v50 = vpop.f32.mrb[9].mxu0  ;;  %v1274_v32 = vpack.c.bf16 %v562_v31, %v560_v30  ;;  %v565_v33 = vld [vmem:[%s2215_s3 + $0x548] sm:$0xf]  ;;  %v350_v34 = vadd.f32 %v1990_v46, %v1918_v37  ;;  %v564_v7 = vld [vmem:[%s2215_s3 + $0x540] sm:$0xf] }
  0xef   :  { %v352_v52 = vadd.f32 %v351_v50, %v1918_v37  ;;  %1249 = vmatprep.subr.bf16.mxu1 %v1248_v36  ;;  %668 = vmatprep.mubr.f32.mxu0 %v391_v45  ;;  %v1087_v30 = vld [vmem:[%s2216_s4 + $0x48] sm:$0xff]  ;;  %v1086_v31 = vld [vmem:[%s2216_s4 + $0x40] sm:$0xff] }
  0xf0   :  { %757 = vmatprep.mubr.f32.mxu1 %v393_v49  ;;  %669 = vmatmul.mubr.f32.gmra.mrb[22].mxu0 %v390_v44  ;;  %v376_v36 = vmax.f32 %v350_v34, 0.0  ;;  %v1358_v49 = vmov 0.0|0.0   ;;  %v1088_v34 = vld [vmem:[%s2216_s4 + $0x50] sm:$0xff] }
  0xf1   :  { %v377_v59 = vmax.f32 %v352_v52, 0.0  ;;  %v355_v60 = vpop.f32.mrb[10].mxu0  ;;  %758 = vmatmul.mubr.f32.gmra.mrb[14].mxu1 %v392_v47  ;;  %v934_v47 = vld [vmem:[%s2217_s5] sm:$0xff]  ;;  %1276 = vmatprep.subr.bf16.mxu0 %v1358_v49 }
  0xf2   :  { %1251 = vmatpush1.bf16.msra.mxu1 %v1250_v51  ;;  %v357_v61 = vpop.f32.mrb[11].mxu0  ;;  %v356_v38 = vadd.f32 %v355_v60, %v1929_v48  ;;  %v937_v51 = vld [vmem:[%s2217_s5 + $0x18] sm:$0xff]  ;;  %v942_v60 = vld [vmem:[%s2217_s5 + $0x40] sm:$0xff] }
  0xf3   :  { %1253 = vmatprep.subr.bf16.mxu1 %v1252_v53  ;;  %1082 = vmatprep.mubr.msk.f32.mxu1 %vm566_vm2, %v377_v59  ;;  %v358_v35 = vadd.f32 %v357_v61, %v1929_v48  ;;  %v938_v53 = vld [vmem:[%s2217_s5 + $0x20] sm:$0xff]  ;;  %v1286_v59 = vpack.c.bf16 %v941_v58, %v940_v57  ;;  %v943_v61 = vld [vmem:[%s2217_s5 + $0x48] sm:$0xff] }
  0xf4   :  { %v382_v41 = vmax.f32 %v356_v38, 0.0  ;;  %v1283_v56 = vpack.c.bf16 %v939_v55, %v938_v53  ;;  %v856_v38 = vld [vmem:[%s2216_s4 + $0x18] sm:$0xff]  ;;  %v858_v53 = vld [vmem:[%s2216_s4 + $0x28] sm:$0xff] }
  0xf5   :  { %v361_v4 = vpop.f32.mrb[12].mxu0  ;;  %v383_v39 = vmax.f32 %v358_v35, 0.0  ;;  %v1091_v55 = vld [vmem:[%s2216_s4 + $0x68] sm:$0xff] }
  0xf6   :  { %1255 = vmatpush1.bf16.msra.mxu1 %v1254_v62  ;;  %v363_v6 = vpop.f32.mrb[13].mxu0  ;;  %v362_v37 = vadd.f32 %v361_v4, %v1938_v54  ;;  %v1289_v62 = vpack.c.bf16 %v943_v61, %v942_v60  ;;  %v1295_v4 = vpack.c.bf16 %v947_v3, %v946_v2  ;;  %v859_v3 = vld [vmem:[%s2216_s4 + $0x30] sm:$0xff] }
  0xf7   :  { %1257 = vmatprep.subr.bf16.mxu1 %v1256_v63  ;;  %v364_v40 = vadd.f32 %v363_v6, %v1938_v54  ;;  %v935_v54 = vld [vmem:[%s2217_s5 + $0x8] sm:$0xff]  ;;  %v944_v63 = vld [vmem:[%s2217_s5 + $0x50] sm:$0xff]  ;;  %v949_v6 = vld [vmem:[%s2217_s5 + $0x78] sm:$0xff] }
  0xf8   :  { %v388_v44 = vmax.f32 %v362_v37, 0.0  ;;  %v1277_v50 = vpack.c.bf16 %v935_v54, %v934_v47  ;;  %v1292_v1 = vpack.c.bf16 %v945_v0, %v944_v63  ;;  %v857_v47 = vld [vmem:[%s2216_s4 + $0x20] sm:$0xff] }
  0xf9   :  { %v367_v13 = vpop.f32.mrb[14].mxu0  ;;  %v389_v42 = vmax.f32 %v364_v40, 0.0  ;;  %v1090_v54 = vld [vmem:[%s2216_s4 + $0x60] sm:$0xff] }
  0xfa   :  { %1259 = vmatpush1.bf16.msra.mxu1 %v1258_v5  ;;  %v369_v15 = vpop.f32.mrb[15].mxu0  ;;  %v368_v45 = vadd.f32 %v367_v13, %v1966_v24  ;;  %1278 = vmatpush1.bf16.msra.mxu0 %v1277_v50  ;;  %v948_v5 = vld [vmem:[%s2217_s5 + $0x70] sm:$0xff]  ;;  %v953_v13 = vld [vmem:[%s2217_s5 + $0x98] sm:$0xff] }
  0xfb   :  { %1261 = vmatprep.subr.bf16.mxu1 %v1260_v8  ;;  %v370_v43 = vadd.f32 %v369_v15, %v1966_v24  ;;  %1279 = vmatprep.subr.bf16.mxu0 %v1358_v49  ;;  %v936_v24 = vld [vmem:[%s2217_s5 + $0x10] sm:$0xff]  ;;  %v1298_v8 = vpack.c.bf16 %v949_v6, %v948_v5 }
  0xfc   :  { %v394_v46 = vmax.f32 %v368_v45, 0.0  ;;  %v1280_v52 = vpack.c.bf16 %v937_v51, %v936_v24 }
  0xfd   :  { %v395_v48 = vmax.f32 %v370_v43, 0.0 }
  0xfe   :  { %1263 = vmatpush1.bf16.msra.mxu1 %v1262_v14  ;;  %1281 = vmatpush1.bf16.msra.mxu0 %v1280_v52  ;;  %v1304_v14 = vpack.c.bf16 %v953_v13, %v952_v12 }
  0xff   :  { %1265 = vmatprep.subr.bf16.mxu1 %v1264_v16  ;;  %1282 = vmatprep.subr.bf16.mxu0 %v1358_v49 }
 0x102   :  { %1267 = vmatpush1.bf16.msra.mxu1 %v1266_v21  ;;  %1284 = vmatpush1.bf16.msra.mxu0 %v1283_v56 }
 0x103   :  { %1269 = vmatprep.subr.bf16.mxu1 %v1268_v22  ;;  %1285 = vmatprep.subr.bf16.mxu0 %v1358_v49 }
 0x106   :  { %1271 = vmatpush1.bf16.msra.mxu1 %v1270_v28  ;;  %1287 = vmatpush1.bf16.msra.mxu0 %v1286_v59  ;;  %v854_v28 = vld [vmem:[%s2216_s4 + $0x8] sm:$0xff] }
 0x107   :  { %1273 = vmatprep.subr.bf16.mxu1 %v1272_v29  ;;  %1288 = vmatprep.subr.bf16.mxu0 %v1358_v49  ;;  %v853_v29 = vld [vmem:[%s2216_s4] sm:$0xff] }
 0x10a   :  { %1275 = vmatpush1.bf16.msra.mxu1 %v1274_v32  ;;  %1290 = vmatpush1.bf16.msra.mxu0 %v1289_v62 }
 0x10b   :  { %1080 = vmatprep.subr.msk.mxu1 %vm579_vm3, %v565_v33  ;;  %1291 = vmatprep.subr.bf16.mxu0 %v1358_v49  ;;  %v855_v33 = vld [vmem:[%s2216_s4 + $0x10] sm:$0xff] }
 0x10e   :  { %1081 = vmatpush1.msk.msra.mxu1 %vm579_vm3, %v564_v7  ;;  %1293 = vmatpush1.bf16.msra.mxu0 %v1292_v1 }
 0x10f   :  { %829 = vmatmul.mubr.f32.vlgmr.msra.gmra.mrb[8].mxu1 %v376_v36  ;;  %1294 = vmatprep.subr.bf16.mxu0 %v1358_v49 }
 0x110   :  { %1083 = vmatprep.mubr.msk.f32.mxu1 %vm566_vm2, %v383_v39  ;;  %v1089_v39 = vld [vmem:[%s2216_s4 + $0x58] sm:$0xff] }
 0x112   :  { %1296 = vmatpush1.bf16.msra.mxu0 %v1295_v4  ;;  %v1092_v4 = vld [vmem:[%s2216_s4 + $0x70] sm:$0xff] }
 0x113   :  { %835 = vmatmul.mubr.f32.gmra.mrb[10].mxu1 %v382_v41  ;;  %1297 = vmatprep.subr.bf16.mxu0 %v1358_v49 }
 0x114   :  { %1084 = vmatprep.mubr.msk.f32.mxu1 %vm566_vm2, %v389_v42 }
 0x116   :  { %1299 = vmatpush1.bf16.msra.mxu0 %v1298_v8 }
 0x117   :  { %841 = vmatmul.mubr.f32.gmra.mrb[12].mxu1 %v388_v44  ;;  %1300 = vmatprep.subr.bf16.mxu0 %v1358_v49 }
 0x118   :  { %1085 = vmatprep.mubr.msk.f32.mxu1 %vm566_vm2, %v395_v48 }
 0x11a   :  { %1302 = vmatpush1.bf16.msra.mxu0 %v1301_v11  ;;  %v1093_v11 = vld [vmem:[%s2216_s4 + $0x78] sm:$0xff] }
 0x11b   :  { %847 = vmatmul.mubr.f32.gmra.mrb[14].mxu1 %v394_v46  ;;  %1303 = vmatprep.subr.bf16.mxu0 %v1358_v49 }
 0x11e   :  { %1305 = vmatpush1.bf16.msra.mxu0 %v1304_v14 }
 0x1b7   :  { %v652_v15 = vpop.f32.mrb[16].mxu0 }
 0x1b8   :  { %v654_v16 = vpop.f32.mrb[17].mxu0 }
 0x1bb   :  { %v658_v17 = vpop.f32.mrb[18].mxu0 }
 0x1bc   :  { %v660_v18 = vpop.f32.mrb[19].mxu0 }
 0x1bf   :  { %v664_v19 = vpop.f32.mrb[20].mxu0 }
 0x1c0   :  { %v666_v20 = vpop.f32.mrb[21].mxu0 }
 0x1c3   :  { %v670_v21 = vpop.f32.mrb[22].mxu0 }
 0x1c4   :  { %v672_v22 = vpop.f32.mrb[23].mxu0 }
 0x1e2   :  { %v830_v23 = vpop.f32.mrb[8].mxu1 }
 0x1e3   :  { %v1306_v25 = vadd.f32 %v830_v23, %v652_v15  ;;  %v832_v26 = vpop.f32.mrb[9].mxu1 }
 0x1e4   :  { %v1307_v27 = vadd.f32 %v832_v26, %v654_v16 }
 0x1e5   :  { %v861_v37 = vmul.f32 %v1306_v25, %v853_v29  ;;  %v901_v42 = vmul.f32 %v1306_v25, %v1086_v31 }
 0x1e6   :  { %v836_v32 = vpop.f32.mrb[10].mxu1  ;;  %v862_v35 = vmul.f32 %v1307_v27, %v854_v28  ;;  %v902_v40 = vmul.f32 %v1307_v27, %v1087_v30 }
 0x1e7   :  { %v1308_v7 = vadd.f32 %v836_v32, %v658_v17  ;;  %v838_v36 = vpop.f32.mrb[11].mxu1 }
 0x1e8   :  { %v1309_v41 = vadd.f32 %v838_v36, %v660_v18  ;;  %v879_v49 = vsel %vm878_vm4, %v862_v35, 0.0  ;;  %v918_v56 = vsel %vm878_vm4, %v902_v40, 0.0 }
 0x1e9   :  { %v863_v43 = vmul.f32 %v1308_v7, %v855_v33  ;;  %v903_v44 = vmul.f32 %v1308_v7, %v1088_v34 }
 0x1ea   :  { %v864_v45 = vmul.f32 %v1309_v41, %v856_v38  ;;  %v904_v48 = vmul.f32 %v1309_v41, %v1089_v39  ;;  %v842_v46 = vpop.f32.mrb[12].mxu1 }
 0x1eb   :  { %v869_v50 = vadd.f32 %v863_v43, %v861_v37  ;;  %v909_v24 = vadd.f32 %v903_v44, %v901_v42  ;;  %v1310_v51 = vadd.f32 %v842_v46, %v664_v19  ;;  %v844_v52 = vpop.f32.mrb[13].mxu1 }
 0x1ec   :  { %v880_v57 = vsel %vm878_vm4, %v864_v45, 0.0  ;;  %v919_v58 = vsel %vm878_vm4, %v904_v48, 0.0  ;;  %v1311_v59 = vadd.f32 %v844_v52, %v666_v20 }
 0x1ed   :  { %v881_v60 = vadd.f32 %v880_v57, %v879_v49  ;;  %v920_v61 = vadd.f32 %v919_v58, %v918_v56  ;;  %v865_v62 = vmul.f32 %v1310_v51, %v857_v47  ;;  %v905_v63 = vmul.f32 %v1310_v51, %v1090_v54  ;;  %v1094_v51 = vld [vmem:[%s2218_s6] ss:$0 sm:$0xff]  ;;  %s1054_s6 = sshll.u32 %s1359_s2, 4  ;;  %s1055_s6 = int_to_ptr.vmem [resolvable:$true] %s1054_s6 }
 0x1ee   :  { %v866_v0 = vmul.f32 %v1311_v59, %v858_v53  ;;  %v906_v1 = vmul.f32 %v1311_v59, %v1091_v55  ;;  %v848_v2 = vpop.f32.mrb[14].mxu1  ;;  %s1332_s24 = scalar_lea.vmem %s1055_s6, 32  ;;  %p1337_p1 = scmp.lt.s32.totalorder %s1055_s6, %s1055_s6 }
 0x1ef   :  { %v870_v5 = vadd.f32 %v869_v50, %v865_v62  ;;  %v910_v6 = vadd.f32 %v909_v24, %v905_v63  ;;  %v1312_v8 = vadd.f32 %v848_v2, %v670_v21  ;;  %v850_v9 = vpop.f32.mrb[15].mxu1  ;;  %p1333_p0 = scmp.ne.s32.totalorder %s1055_s6, %s1332_s24  ;;  %p1338_p2 = scmp.lt.s32.totalorder %s1332_s24, %s1332_s24 }
 0x1f0   :  { %v882_v12 = vsel %vm878_vm4, %v866_v0, 0.0  ;;  %v921_v13 = vsel %vm878_vm4, %v906_v1, 0.0  ;;  %v1313_v14 = vadd.f32 %v850_v9, %v672_v22 }
 0x1f1   :  { %v883_v15 = vadd.f32 %v882_v12, %v881_v60  ;;  %v922_v16 = vadd.f32 %v921_v13, %v920_v61  ;;  %v867_v17 = vmul.f32 %v1312_v8, %v859_v3  ;;  %v907_v18 = vmul.f32 %v1312_v8, %v1092_v4  ;;  %p1339_p3 = por %p1338_p2, %p1337_p1 }
 0x1f2   :  { %v868_v19 = vmul.f32 %v1313_v14, %v860_v10  ;;  %v908_v20 = vmul.f32 %v1313_v14, %v1093_v11 }
 0x1f3   :  { %v871_v21 = vadd.f32 %v870_v5, %v867_v17  ;;  %v911_v23 = vadd.f32 %v910_v6, %v907_v18  ;;  %p1340_p4 = pnand %p1339_p3, %p1333_p0 }
 0x1f4   :  { %v884_v25 = vsel %vm878_vm4, %v868_v19, 0.0  ;;  %v923_v26 = vsel %vm878_vm4, %v908_v20, 0.0 }
 0x1f5   :  { %v872_v27 = vrot.slane %v871_v21, 4  ;;  %v912_v28 = vrot.slane %v911_v23, 4  ;;  %v885_v29 = vadd.f32 %v884_v25, %v883_v15  ;;  %v924_v30 = vadd.f32 %v923_v26, %v922_v16 }
 0x1f7   :  { %v873_v31 = vadd.f32 %v872_v27, %v871_v21  ;;  %v913_v32 = vadd.f32 %v912_v28, %v911_v23  ;;  %v886_v33 = vrot.slane %v885_v29, 4  ;;  %v925_v22 = vrot.slane %v924_v30, 4 }
 0x1f9   :  { %v874_v34 = vrot.slane %v873_v31, 2  ;;  %v914_v35 = vrot.slane %v913_v32, 2  ;;  %v887_v7 = vadd.f32 %v886_v33, %v885_v29  ;;  %v926_v36 = vadd.f32 %v925_v22, %v924_v30 }
 0x1fb   :  { %v875_v38 = vadd.f32 %v874_v34, %v873_v31  ;;  %v915_v39 = vadd.f32 %v914_v35, %v913_v32  ;;  %v888_v40 = vrot.slane %v887_v7, 2  ;;  %v927_v41 = vrot.slane %v926_v36, 2 }
 0x1fd   :  { %v876_v37 = vrot.slane %v875_v38, 1  ;;  %v916_v42 = vrot.slane %v915_v39, 1  ;;  %v889_v43 = vadd.f32 %v888_v40, %v887_v7  ;;  %v928_v44 = vadd.f32 %v927_v41, %v926_v36 }
 0x1ff   :  { %v890_v45 = vrot.slane %v889_v43, 1  ;;  %v929_v48 = vrot.slane %v928_v44, 1  ;;  %v877_v46 = vadd.f32 %v876_v37, %v875_v38  ;;  %v917_v47 = vadd.f32 %v916_v42, %v915_v39 }
 0x201   :  { %v891_v54 = vadd.f32 %v890_v45, %v889_v43  ;;  %v930_v49 = vadd.f32 %v929_v48, %v928_v44  ;;  %v932_v50 = vsel %vm931_vm5, %v877_v46, %v917_v47 }
 0x203   :  { %v933_v24 = vsel %vm931_vm5, %v891_v54, %v930_v49 }
 0x204   :  { %1095 = vmatprep.mubr.msk.f32.mxu0 %vm878_vm4, %v933_v24 }
 0x205   :  { %1029 = vmatmul.mubr.f32.vlgmr.msra.gmra.mrb[24].mxu0 %v932_v50 }
 0x2d8   :  { %v1030_v52 = vpop.f32.mrb[24].mxu0 }
 0x2d9   :  { %v1031_v53 = vadd.f32 %v1094_v51, %v1030_v52  ;;  %v1032_v55 = vpop.f32.mrb[25].mxu0 }
 0x2db   :  { %v1035_v56 = vsel %vm1034_vm6, %v1031_v53, -inf }
 0x2dc   :  { %1036 = vmax.xlane.f32.xlu0 %v1035_v56 }
 0x369   :  { %v1037_v57 = vpop.xlane.xlu0 %1036 }
 0x36a   :  { %v1038_v58 = vsub.f32 %v1031_v53, %v1037_v57 }
 0x36c   :  { %v1039_v59 = vmul.f32 1.442695, %v1038_v58 }
 0x36e   :  { %1328 = vpow2.f32 %v1039_v59 }
 0x378   :  { %v1329_v60 = vpop.eup %1328 }
 0x379   :  { %v1041_v61 = vsel %vm1034_vm6, %v1329_v60, 0.0 }
 0x37a   :  { %1042 = vadd.xlane.f32.xlu1 %v1041_v61 }
 0x407   :  { %v1043_v62 = vpop.xlane.xlu1 %1042 }
 0x408   :  { %1330 = vlog2.f32 %v1043_v62 }
 0x412   :  { %v1331_v63 = vpop.eup %1330 }
 0x413   :  { %v1045_v0 = vmul.f32 0.6931472, %v1331_v63 }
 0x415   :  { %v1046_v1 = vsub.f32 %v1038_v58, %v1045_v0 }
 0x417   :  { %1047 = vst.msk [vmem:[#allocation2] sm:$0x3] %vm1034_vm6, %v1046_v1 }
 0x418   :  { %1343 = shalt.err (!%p1340_p4)
}
 0x419   :  { %s1344_s27 = scalar_lea.hbm %s2219_s7, 32 }
 0x41a   :  { %p1345_p5 = scmp.ne.s32.totalorder %s2219_s7, %s1344_s27  ;;  %p1348_p6 = scmp.lt.u32.totalorder %s1344_s27, %s2219_s7 }
 0x41c   :  { %p1350_p7 = pnand %p1348_p6, %p1345_p5 }
 0x41e   :  { %1353 = shalt.err (!%p1350_p7)
}
 0x41f   :  { %1057 = dma.vmem_to_hbm [thread:$0]  %s1055_s6, 32, %s2219_s7, [#allocation3]  }
 0x420   :  { %1354 = dma.done.wait [#allocation3], 32  }
 0x421   :  { %1355 = vsyncadd [#allocation3], 4294967264 }
 0x422   :  { %1061 = vsyncpa [#allocation3], 1 }

</bundles_post_ra>
